<compile_context>
chip_gen: v7x
topology: tpu7x:2x2x1
jax: 0.10.0
libtpu: 0.0.40
codegen_flags: <defaults>
</compile_context>

<pallas_src>
import jax
import jax.numpy as jnp
from jax.experimental import pallas as pl
from jax.experimental.pallas import tpu as pltpu

EPS = 1e-4
_MIB = 1024 * 1024


def _round_up(x, m):
    return ((x + m - 1) // m) * m


def _vmem_capacity_bytes():
    # Per-generation physical VMEM (v5e/v6e: 128 MiB, v7x: 64 MiB). Fall back
    # to the smallest (v7x) value if the query is unavailable at trace time.
    try:
        return int(pltpu.get_tpu_info().vmem_capacity_bytes)
    except Exception:
        return 64 * _MIB


def _make_kernel(dim_z, eps, alpha, beta, gamma, needs_slice):
    # alpha/beta/gamma/eps are trace-time constants (no SMEM prefetch).
    #
    # Constant-denominator simplification: after eps-smoothing, the row total
    # is exactly 1 + (dim_z+1)*eps up to f32 rounding (a deliberate ~ulp-level
    # approximation, far inside the 1e-5 tolerance), so the reference's second
    # row reduction + divide is folded into `scale`.
    scale = 1.0 / (1.0 + (dim_z + 1) * eps)
    eps_scaled = eps * scale

    def kernel(x_ref, out_ref):
        # x_ref:   VMEM (TB, dim_z) fast path, or (TB, 2*dim_z) fallback
        # out_ref: VMEM (TB, dim_z + 1); block minor == full array minor.
        x = x_ref[...].astype(jnp.float32)
        # Fallback only (small, non-lane-aligned dim_z): in-kernel slice of
        # the second half. Acceptable for tiny widths.
        # TODO(synk): masked full-width reduction for large unaligned dim_z
        # to avoid the lane-crossing relayout copy.
        d = x[:, dim_z:] if needs_slice else x

        # intervention logits
        il = alpha + beta * jnp.abs(d) + gamma * d * d            # (TB, dim_z)

        # Softmax over [0, il_0, ..., il_{dim_z-1}]; the constant zero logit
        # is handled analytically (no extra lane needed for the reductions).
        m = jnp.maximum(jnp.max(il, axis=1, keepdims=True), 0.0)  # (TB, 1)
        e0 = jnp.exp(-m)                                          # (TB, 1)
        er = jnp.exp(il - m)                                      # (TB, dim_z)
        denom = e0 + jnp.sum(er, axis=1, keepdims=True)           # (TB, 1)
        c1 = scale / denom                                        # exact divide

        # Assemble the full (TB, dim_z+1) row once (XLU lane shift, free slot)
        # and do a single full-block store instead of a 1-lane masked store
        # plus a lane-shifted partial store.
        row = jnp.concatenate(
            [e0 * c1 + eps_scaled, er * c1 + eps_scaled], axis=1)
        out_ref[...] = row.astype(out_ref.dtype)

        # NOTE: rows past `batch` in a ragged last tile see unspecified HBM
        # data; all math is row-local and those output rows are discarded, so
        # valid rows are unaffected. Do not add cross-row reductions here.

    return kernel


def heuristic_intervention_encoder(inputs, alpha=-3.0, beta=15.0, gamma=15.0,
                                   eps=EPS, block_rows=None):
    """Pallas implementation of HeuristicInterventionEncoder.forward."""
    alpha, beta, gamma, eps = float(alpha), float(beta), float(gamma), float(eps)
    batch, width = inputs.shape
    assert width % 2 == 0, "inputs last dim must be 2*dim_z"
    dim_z = width // 2
    out_cols = dim_z + 1

    in_itemsize = jnp.dtype(inputs.dtype).itemsize
    out_itemsize = in_itemsize
    # Sublane packing granularity for the row tiling (8 rows for 4-byte
    # dtypes, 16 for bf16/f16, 32 for 1-byte dtypes).
    sub = {4: 8, 2: 16, 1: 32}.get(in_itemsize, 8)

    # Fast path: when dim_z is lane-aligned, DMA only the second half of the
    # input (block column index 1) -> input HBM bytes halved.
    half_dma = (dim_z % 128 == 0)
    in_cols = dim_z if half_dma else width

    # VMEM working set per block:
    #   2x double-buffered input tile + 2x double-buffered output tile
    #   + ~4 in-kernel f32 temporaries (x_f32/|d|, il, er, assembled row).
    per_row = (2 * in_cols * in_itemsize
               + 2 * out_cols * out_itemsize
               + 4 * 4 * max(in_cols, out_cols))
    vmem_cap = _vmem_capacity_bytes()

    if block_rows is None:
        budget = min(vmem_cap // 4, 16 * _MIB)
        vmem_rows = max(sub, (budget // max(per_row, 1)) // sub * sub)
        # Keep the grid at >= ~4 steps so v7x's two TensorCores get work and
        # the DMA/compute pipeline has something to overlap everywhere.
        target_steps = 4
        par_rows = _round_up(max(1, pl.cdiv(batch, target_steps)), sub)
        block_rows = max(sub, min(vmem_rows, par_rows))
    else:
        block_rows = max(sub, _round_up(block_rows, sub))
    assert block_rows % sub == 0

    grid = (pl.cdiv(batch, block_rows),)

    if half_dma:
        # DMA only inputs[:, dim_z:] -> column block index 1.
        in_spec = pl.BlockSpec((block_rows, dim_z), lambda i: (i, 1))
    else:
        in_spec = pl.BlockSpec((block_rows, width), lambda i: (i, 0))
    # Output block minor == full array minor -> contiguous writeback DMA.
    # This must stay the full width (shrinking it would break the (8,128)
    # rule / regress to masked stores).
    out_spec = pl.BlockSpec((block_rows, out_cols), lambda i: (i, 0))

    vmem_limit = int(max(16 * _MIB,
                         min(vmem_cap, block_rows * per_row + 8 * _MIB)))

    cost = pl.CostEstimate(
        flops=8 * batch * dim_z,
        transcendentals=batch * (dim_z + 1),
        bytes_accessed=batch * (in_cols * in_itemsize
                                + out_cols * out_itemsize),
    )

    return pl.pallas_call(
        _make_kernel(dim_z, eps, alpha, beta, gamma,
                     needs_slice=not half_dma),
        out_shape=jax.ShapeDtypeStruct((batch, out_cols), inputs.dtype),
        grid_spec=pltpu.PrefetchScalarGridSpec(
            num_scalar_prefetch=0,
            grid=grid,
            in_specs=[in_spec],
            out_specs=out_spec,
        ),
        compiler_params=pltpu.CompilerParams(
            dimension_semantics=("parallel",),
            vmem_limit_bytes=vmem_limit),
        cost_estimate=cost,
    )(inputs)


def _reference(inputs, alpha=-3.0, beta=15.0, gamma=15.0, eps=EPS):
    """Pure-JAX reference mirroring the PyTorch forward."""
    inputs = jnp.asarray(inputs, jnp.float32)
    dim_z = inputs.shape[1] // 2
    d = inputs[:, dim_z:]
    il = alpha + beta * jnp.abs(d) + gamma * d ** 2
    zero = jnp.zeros((inputs.shape[0], 1), inputs.dtype)
    logits = jnp.concatenate([zero, il], axis=1)
    probs = jax.nn.softmax(logits, axis=1)
    probs = probs + eps
    return probs / jnp.sum(probs, axis=1, keepdims=True)


if __name__ == "__main__":
    alpha, beta, gamma = -3.0, 15.0, 15.0
    k1, k2 = jax.random.split(jax.random.PRNGKey(0))

    # Case 1: lane-aligned dim_z (half-input DMA fast path), multi-step grid
    # with a ragged last tile.  batch=200, dim_z=128 -> inputs (200, 256).
    x1 = jax.random.normal(k1, (200, 256), dtype=jnp.float32) * 0.3
    out1 = jax.block_until_ready(
        heuristic_intervention_encoder(x1, alpha, beta, gamma))
    ref1 = _reference(x1, alpha, beta, gamma)
    assert out1.shape == (200, 129), out1.shape
    assert jnp.allclose(out1, ref1, atol=1e-5, rtol=1e-5)
    assert jnp.allclose(jnp.sum(out1, axis=1), 1.0, atol=1e-5)

    # Case 2: small, non-lane-aligned dim_z (fallback full-width block).
    x2 = jax.random.normal(k2, (16, 18), dtype=jnp.float32) * 0.3
    out2 = jax.block_until_ready(
        heuristic_intervention_encoder(x2, alpha, beta, gamma))
    ref2 = _reference(x2, alpha, beta, gamma)
    assert out2.shape == (16, 10), out2.shape
    assert jnp.allclose(out2, ref2, atol=1e-5, rtol=1e-5)
    assert jnp.allclose(jnp.sum(out2, axis=1), 1.0, atol=1e-5)

    print("KERNEL_OK")
</pallas_src>

<mosaic_0001>
module attributes {stable_mosaic.version = 11 : i64} {
  func.func @kernel(%arg0: i32, %arg1: memref<56x128xf32, #tpu.memory_space<vmem>>, %arg2: memref<56x129xf32, #tpu.memory_space<vmem>>) attributes {dimension_semantics = [#tpu.dimension_semantics<parallel>], iteration_bounds = array<i64: 4>, scalar_prefetch = 0 : i64, scratch_operands = 0 : i64, tpu.core_type = #tpu.core_type<tc>, window_params = [{transform_indices = @transform_0, window_bounds = array<i64: 56, 128>}, {transform_indices = @transform_1, window_bounds = array<i64: 56, 129>}]} {
    %c0 = arith.constant 0 : index
    %c0_0 = arith.constant 0 : index
    %0 = vector.load %arg1[%c0, %c0_0] : memref<56x128xf32, #tpu.memory_space<vmem>>, vector<56x128xf32>
    %1 = math.absf %0 : vector<56x128xf32>
    %cst = arith.constant 1.500000e+01 : f32
    %2 = vector.broadcast %cst : f32 to vector<56x128xf32>
    %3 = arith.mulf %2, %1 : vector<56x128xf32>
    %cst_1 = arith.constant -3.000000e+00 : f32
    %4 = vector.broadcast %cst_1 : f32 to vector<56x128xf32>
    %5 = arith.addf %4, %3 : vector<56x128xf32>
    %cst_2 = arith.constant 1.500000e+01 : f32
    %6 = vector.broadcast %cst_2 : f32 to vector<56x128xf32>
    %7 = arith.mulf %6, %0 : vector<56x128xf32>
    %8 = arith.mulf %7, %0 : vector<56x128xf32>
    %9 = arith.addf %5, %8 : vector<56x128xf32>
    %cst_3 = arith.constant dense<0xFF800000> : vector<56xf32>
    %10 = vector.multi_reduction <maximumf>, %9, %cst_3 [1] : vector<56x128xf32> to vector<56xf32>
    %11 = vector.shape_cast %10 : vector<56xf32> to vector<56x1xf32>
    %cst_4 = arith.constant 0.000000e+00 : f32
    %12 = vector.broadcast %cst_4 : f32 to vector<56x1xf32>
    %13 = arith.maximumf %11, %12 : vector<56x1xf32>
    %cst_5 = arith.constant 0.000000e+00 : f32
    %14 = vector.broadcast %cst_5 : f32 to vector<56x1xf32>
    %15 = arith.subf %14, %13 : vector<56x1xf32>
    %16 = math.exp %15 : vector<56x1xf32>
    %17 = vector.broadcast %13 : vector<56x1xf32> to vector<56x128xf32>
    %18 = arith.subf %9, %17 : vector<56x128xf32>
    %19 = math.exp %18 : vector<56x128xf32>
    %cst_6 = arith.constant dense<0.000000e+00> : vector<56xf32>
    %20 = vector.multi_reduction <add>, %19, %cst_6 [1] : vector<56x128xf32> to vector<56xf32>
    %21 = vector.shape_cast %20 : vector<56xf32> to vector<56x1xf32>
    %22 = arith.addf %16, %21 : vector<56x1xf32>
    %cst_7 = arith.constant 0.987264275 : f32
    %23 = vector.broadcast %cst_7 : f32 to vector<56x1xf32>
    %24 = arith.divf %23, %22 : vector<56x1xf32>
    %25 = arith.mulf %16, %24 : vector<56x1xf32>
    %cst_8 = arith.constant 9.87264284E-5 : f32
    %26 = vector.broadcast %cst_8 : f32 to vector<56x1xf32>
    %27 = arith.addf %25, %26 : vector<56x1xf32>
    %28 = vector.broadcast %24 : vector<56x1xf32> to vector<56x128xf32>
    %29 = arith.mulf %19, %28 : vector<56x128xf32>
    %cst_9 = arith.constant 9.87264284E-5 : f32
    %30 = vector.broadcast %cst_9 : f32 to vector<56x128xf32>
    %31 = arith.addf %29, %30 : vector<56x128xf32>
    %32 = tpu.concatenate %27, %31 in 1 : vector<56x1xf32>, vector<56x128xf32> -> vector<56x129xf32>
    %c0_10 = arith.constant 0 : index
    %c0_11 = arith.constant 0 : index
    %33 = vector.load %arg2[%c0_10, %c0_11] : memref<56x129xf32, #tpu.memory_space<vmem>>, vector<56x129xf32>
    tpu.vector_store %arg2[%c0_10, %c0_11], %32 {strides = array<i32>} : memref<56x129xf32, #tpu.memory_space<vmem>>, vector<56x129xf32>,
    return
  }
  func.func @transform_0(%arg0: i32) -> (i32, i32) {
    %c1_i32 = arith.constant 1 : i32
    %c0_i32 = arith.constant 0 : i32
    return %arg0, %c1_i32 : i32, i32
  }
  func.func @transform_1(%arg0: i32) -> (i32, i32) {
    %c0_i32 = arith.constant 0 : i32
    %c0_i32_0 = arith.constant 0 : i32
    return %arg0, %c0_i32 : i32, i32
  }
}

</mosaic_0001>

<bundles_post_ra>
// kernel: tpu_custom_call.1
= control target key start
LH: loop header
LB: loop body
LE: loop exit
PB: predicated region body
PF: predicated region fallthrough
CT: control target
= control target key end

     0   :  { %6 = vsyncpa [#allocation3], 0  ;;  %s1170_s0 = inlined_call_operand.hbm [shape: f32[200,256], index: 0, kind: input, shape index: {}]   ;;  %s1171_s1 = inlined_call_operand.vmem [shape: f32[200,129], index: 1, kind: output, shape index: {}]  }
   0x1   :  { %8 = vsyncpa [#allocation3 + $0x1], 0  ;;  %s896_s6 = smov 0   ;;  %s898_s7 = smov 0  }
   0x2   :  { %s900_s8 = smov 0   ;;  %s902_s9 = smov 0  }
   0x3 LB: > { %s915_s10 = sadd.s32 4294967295, %s847_s9   ;;  %s918_s11 = sadd.s32 1, %s847_s9   ;;  %s847_s9 = sphi %s902_s9, %s1180_s9   ;;  %s843_s8 = sphi %s900_s8, %s1179_s8   ;;  %s839_s7 = sphi %s898_s7, %s1178_s7   ;;  %s835_s6 = sphi %s896_s6, %s1177_s6  }
   0x4   : > { %s18_s12 = ssub.s32 %s847_s9, %s918_s11  ;;  %s21_s13 = sadd.s32 1, %s843_s8 }
   0x5   : > { %p19_p0 = scmp.eq.s32.totalorder %s18_s12, 0  ;;  %p28_p1 = scmp.ne.s32.totalorder %s843_s8, %s839_s7 }
   0x6   : > { %p29_p2 = scmp.eq.s32.totalorder %s847_s9, 0  ;;  %p34_p3 = scmp.ne.s32.totalorder %s839_s7, %s835_s6 }
   0x7   : > { %s928_s14 = scalar_select %p19_p0, %s843_s8, %s21_s13  }
   0x8   : > { %p30_p4 = por %p29_p2, %p28_p1  ;;  %p35_p5 = scmp.eq.s32.totalorder %s915_s10, 0 }
   0x9   : > { %p58_p6 = scmp.eq.s32.totalorder %s915_s10, 3  ;;  %p575_p9 = scmp.ge.s32.totalorder %s847_s9, 4 }
   0xa   : > { %p932_p7 = por %p35_p5, %p34_p3 }
   0xb   : > { %p936_p8 = por %p58_p6, %p28_p1  ;;  %80 = sbr.rel (%p575_p9) target bundleno = 55 (0x37), region = 16 }
  0x12   : > { %83 = sbr.rel (!%p30_p4) target bundleno = 55 (0x37), region = 20  ;;  %s84_s17 = sand.u32 (%p30_p4), 1, %s843_s8  }
  0x13   : > { %s89_s18 = smul.u32 (%p30_p4), 7, %s847_s9  ;;  %s946_s23 = scalar_lea.sflag (%p30_p4), [#allocation3], %s84_s17 }
  0x14   : > { %s600_s19 = smul.u32 (%p30_p4), 56, %s84_s17 }
  0x15   : > { %s90_s20 = ssub.s32 (%p30_p4), 25, %s89_s18 }
  0x16   : > { %p91_p10 = scmp.lt.s32.totalorder (%p30_p4), %s90_s20, 7  ;;  %s88_s24 = scalar_lea.vmem (%p30_p4), [#allocation2], %s600_s19 }
  0x19   : > { %s1182_s20 = smov (!%p91_p10, %s90_s20), 7 }
  0x1a   : > { %s943_s21 = sshll.u32 %s1182_s20, 7 }
  0x1b   : > { %s95_s22 = ssub.s32 896, %s943_s21 }
  0x1c   : > { %96 = vsyncadd %s946_s23, %s95_s22  ;;  %p577_p11 = scmp.ne.s32.totalorder %s943_s21, 0  ;;  %s578_s25 = smul.u32 1792, %s847_s9 }
  0x1d   : > { %s103_s26 = sshll.u32 %s88_s24, 4  ;;  %s755_s6 = scalar_lea.hbm %s1170_s0, 6400  ;;  %s954_s26 = int_to_ptr.vmem [resolvable:$true] %s103_s26 }
  0x1e   : > { %s493_s29 = scalar_lea.hbm %s1170_s0, %s578_s25 }
  0x1f   : > { %s956_s30 = scalar_lea.hbm %s493_s29, 128  ;;  %s779_s2 = scalar_lea.hbm %s493_s29, %s943_s21 }
  0x20   : > { %s780_s3 = scalar_lea.hbm %s779_s2, 128  ;;  %p756_p1 = scmp.lt.u32.totalorder %s956_s30, %s1170_s0 }
  0x21   : > { %p752_p12 = scmp.ne.s32.totalorder %s956_s30, %s780_s3  ;;  %p757_p2 = scmp.lt.u32.totalorder %s755_s6, %s780_s3 }
  0x22   : > { %p759_p4 = scmp.lt.u32.totalorder %s780_s3, %s956_s30 }
  0x23   : > { %p753_p13 = pnand %p752_p12, %p577_p11  ;;  %p758_p3 = por %p757_p2, %p756_p1 }
  0x25   : > { %p754_p0 = pneg %p753_p13  ;;  %p760_p5 = por %p759_p4, %p758_p3 }
  0x27   : > { %p761_p6 = pnand %p760_p5, %p754_p0 }
  0x29   : > { %764 = shalt.err (!%p761_p6)
}
  0x2a   : > { %s765_s17 = scalar_lea.vmem %s954_s26, %s943_s21  ;;  %s881_s18 = smov [#allocation2]  }
  0x2b   : > { %p766_p9 = scmp.ne.s32.totalorder %s954_s26, %s765_s17  ;;  %s769_s19 = sshll.u32 %s881_s18, 4  ;;  %s770_s19 = int_to_ptr.vmem [resolvable:$false] %s769_s19 }
  0x2c   : > { %s771_s20 = scalar_lea.vmem %s770_s19, 1792  ;;  %p772_p13 = scmp.lt.s32.totalorder %s954_s26, %s770_s19 }
  0x2d   : > { %p767_p10 = pnand %p766_p9, %p577_p11  ;;  %p773_p1 = scmp.lt.s32.totalorder %s771_s20, %s765_s17 }
  0x2f   : > { %p768_p12 = pneg %p767_p10  ;;  %p774_p2 = por %p773_p1, %p772_p13 }
  0x31   : > { %p775_p3 = pnand %p774_p2, %p768_p12 }
  0x33   : > { %778 = shalt.err (!%p775_p3)
}
  0x34   : > { %s882_s22 = smov 256   ;;  %s883_s24 = smov 128  }
  0x35   : > { %s884_s25 = smov 8  }
  0x36   : > { %109 = dma.hbm_to_vmem [thread:$0]  (%p577_p11), %s956_s30, %s943_s21, %s954_s26, %s946_s23, %s882_s22, %s883_s24, %s884_s25  }
  0x37 PF: > { %p581_p0 = scmp.ge.s32.totalorder %s847_s9, 1  ;;  %p111_p4 = scmp.lt.s32.totalorder %s847_s9, 5 }
  0x39   : > { %p112_p5 = pnand %p581_p0, %p111_p4 }
  0x3a   : > { %s985_s27 = sand.u32 (!%p112_p5), 1, %s839_s7  }
  0x3b   : > { %115 = sbr.rel (%p112_p5) target bundleno = 591 (0x24f), region = 24  ;;  %s118_s29 = scalar_lea.sflag (!%p112_p5), [#allocation3], %s985_s27 }
  0x3c   : > { %s601_s28 = smul.u32 (!%p112_p5), 56, %s985_s27 }
  0x3e   : > { %s989_s2 = scalar_lea.vmem (!%p112_p5), [#allocation2], %s601_s28 }
  0x42   : > { %830 = dma.done.wait (%p932_p7), %s118_s29, 896  }
  0x43   : > { %832 = vsyncadd (%p932_p7), %s118_s29, 4294966400  ;;  %v150_v0 = vld [vmem:[%s989_s2] sm:$0xff]  ;;  %v152_v1 = vld [vmem:[%s989_s2 + $0x10] sm:$0xff]  ;;  %s885_s9 = smov 1   ;;  %s602_s15 = smul.u32 112, %s985_s27  ;;  %vm353_vm0 = vcmask 7168  }
  0x44   : > { %v151_v2 = vld [vmem:[%s989_s2 + $0x8] sm:$0xff]  ;;  %v157_v3 = vand.u32 2147483647, %v150_v0  ;;  %v178_v4 = vmul.f32 15.0, %v150_v0  ;;  %v159_v5 = vand.u32 2147483647, %v152_v1 }
  0x45   : > { %v180_v6 = vmul.f32 15.0, %v152_v1  ;;  %v158_v7 = vand.u32 2147483647, %v151_v2  ;;  %v179_v8 = vmul.f32 15.0, %v151_v2  ;;  %v153_v9 = vld [vmem:[%s989_s2 + $0x18] sm:$0xff]  ;;  %v154_v10 = vld [vmem:[%s989_s2 + $0x20] sm:$0xff] }
  0x46   : > { %v164_v11 = vmul.f32 15.0, %v157_v3  ;;  %v185_v12 = vmul.f32 %v178_v4, %v150_v0  ;;  %v166_v13 = vmul.f32 15.0, %v159_v5  ;;  %v155_v15 = vld [vmem:[%s989_s2 + $0x28] sm:$0xff]  ;;  %v160_v18 = vand.u32 2147483647, %v153_v9  ;;  %v156_v28 = vld [vmem:[%s989_s2 + $0x30] sm:$0xff] }
  0x47   : > { %v187_v14 = vmul.f32 %v180_v6, %v152_v1  ;;  %v165_v16 = vmul.f32 15.0, %v158_v7  ;;  %v186_v17 = vmul.f32 %v179_v8, %v151_v2  ;;  %v181_v19 = vmul.f32 15.0, %v153_v9  ;;  %s1039_s21 = scalar_lea.vmem [#allocation4], %s602_s15   ;;  %s382_s23 = smul.u32 (%p936_p8), 7, %s915_s10 }
  0x48   : > { %v171_v20 = vadd.f32 -3.0, %v164_v11  ;;  %v173_v21 = vadd.f32 -3.0, %v166_v13  ;;  %v161_v22 = vand.u32 2147483647, %v154_v10  ;;  %v182_v23 = vmul.f32 15.0, %v154_v10  ;;  %s599_s26 = smul.u32 (%p936_p8), 112, %s915_s10 }
  0x49   : > { %v172_v24 = vadd.f32 -3.0, %v165_v16  ;;  %v167_v25 = vmul.f32 15.0, %v160_v18  ;;  %v188_v26 = vmul.f32 %v181_v19, %v153_v9  ;;  %v162_v27 = vand.u32 2147483647, %v155_v15  ;;  %s383_s30 = ssub.s32 (%p936_p8), 25, %s382_s23 }
  0x4a   : > { %v192_v29 = vadd.f32 %v185_v12, %v171_v20  ;;  %v194_v30 = vadd.f32 %v187_v14, %v173_v21  ;;  %v168_v31 = vmul.f32 15.0, %v161_v22  ;;  %v189_v33 = vmul.f32 %v182_v23, %v154_v10  ;;  %p384_p7 = scmp.lt.s32.totalorder (%p936_p8), %s383_s30, 7  ;;  %s1075_s5 = scalar_lea.vmem (%p936_p8), %s1171_s1, %s599_s26  }
  0x4b   : > { %v174_v32 = vadd.f32 -3.0, %v167_v25  ;;  %v169_v34 = vmul.f32 15.0, %v162_v27  ;;  %v183_v35 = vmul.f32 15.0, %v155_v15  ;;  %v193_v36 = vadd.f32 %v186_v17, %v172_v24 }
  0x4c   : > { %199 = vmax.xlane.f32.xlu0 %v192_v29  ;;  %203 = vmax.xlane.f32.xlu1 %v194_v30  ;;  %v175_v37 = vadd.f32 -3.0, %v168_v31  ;;  %v163_v38 = vand.u32 2147483647, %v156_v28  ;;  %v184_v39 = vmul.f32 15.0, %v156_v28 }
  0x4d   : > { %v195_v40 = vadd.f32 %v188_v26, %v174_v32  ;;  %v176_v41 = vadd.f32 -3.0, %v169_v34  ;;  %v190_v42 = vmul.f32 %v183_v35, %v155_v15 }
  0x4e   : > { %v170_v43 = vmul.f32 15.0, %v163_v38  ;;  %v196_v44 = vadd.f32 %v189_v33, %v175_v37  ;;  %v191_v47 = vmul.f32 %v184_v39, %v156_v28 }
  0x4f   : > { %v197_v45 = vadd.f32 %v190_v42, %v176_v41 }
  0x50   : > { %201 = vmax.xlane.f32.xlu0 %v193_v36  ;;  %205 = vmax.xlane.f32.xlu1 %v195_v40  ;;  %v177_v46 = vadd.f32 -3.0, %v170_v43 }
  0x52   : > { %v198_v48 = vadd.f32 %v191_v47, %v177_v46 }
  0x54   : > { %207 = vmax.xlane.f32.xlu0 %v196_v44  ;;  %209 = vmax.xlane.f32.xlu1 %v197_v45 }
  0x58   : > { %211 = vmax.xlane.f32.xlu0 %v198_v48 }
  0xd9   : > { %v200_v49 = vpop.xlane.xlu0 %199  ;;  %v204_v50 = vpop.xlane.xlu1 %203 }
  0xda   : > { %v213_v51 = vmax.f32 %v200_v49, 0.0  ;;  %v215_v52 = vmax.f32 %v204_v50, 0.0 }
  0xdc   : > { %v241_v53 = vsub.f32 %v192_v29, %v213_v51  ;;  %v243_v54 = vsub.f32 %v194_v30, %v215_v52  ;;  %v220_v20 = vsub.f32 0.0, %v213_v51  ;;  %v222_v22 = vsub.f32 0.0, %v215_v52 }
  0xdd   : > { %v202_v55 = vpop.xlane.xlu0 %201  ;;  %v206_v56 = vpop.xlane.xlu1 %205 }
  0xde   : > { %v248_v57 = vmul.f32 1.442695, %v241_v53  ;;  %v252_v58 = vmul.f32 1.442695, %v243_v54  ;;  %v214_v59 = vmax.f32 %v202_v55, 0.0  ;;  %v216_v60 = vmax.f32 %v206_v56, 0.0 }
  0xdf   : > { %v227_v21 = vmul.f32 1.442695, %v220_v20  ;;  %v231_v24 = vmul.f32 1.442695, %v222_v22 }
  0xe0   : > { %705 = vpow2.f32 %v248_v57  ;;  %v242_v61 = vsub.f32 %v193_v36, %v214_v59  ;;  %v244_v0 = vsub.f32 %v195_v40, %v216_v60  ;;  %v221_v23 = vsub.f32 0.0, %v214_v59 }
  0xe1   : > { %v208_v62 = vpop.xlane.xlu0 %207  ;;  %v210_v63 = vpop.xlane.xlu1 %209  ;;  %707 = vpow2.f32 %v252_v58  ;;  %v223_v25 = vsub.f32 0.0, %v216_v60 }
  0xe2   : > { %v217_v1 = vmax.f32 %v208_v62, 0.0  ;;  %v218_v2 = vmax.f32 %v210_v63, 0.0  ;;  %v250_v3 = vmul.f32 1.442695, %v242_v61  ;;  %v254_v4 = vmul.f32 1.442695, %v244_v0 }
  0xe3   : > { %v229_v26 = vmul.f32 1.442695, %v221_v23  ;;  %v233_v29 = vmul.f32 1.442695, %v223_v25 }
  0xe4   : > { %v245_v5 = vsub.f32 %v196_v44, %v217_v1  ;;  %v246_v6 = vsub.f32 %v197_v45, %v218_v2  ;;  %709 = vpow2.f32 %v250_v3  ;;  %v224_v27 = vsub.f32 0.0, %v217_v1 }
  0xe5   : > { %v212_v7 = vpop.xlane.xlu0 %211  ;;  %711 = vpow2.f32 %v254_v4  ;;  %v225_v28 = vsub.f32 0.0, %v218_v2 }
  0xe6   : > { %v256_v8 = vmul.f32 1.442695, %v245_v5  ;;  %v219_v9 = vmax.f32 %v212_v7, 0.0  ;;  %v258_v10 = vmul.f32 1.442695, %v246_v6 }
  0xe7   : > { %v235_v31 = vmul.f32 1.442695, %v224_v27  ;;  %v237_v32 = vmul.f32 1.442695, %v225_v28 }
  0xe8   : > { %v247_v11 = vsub.f32 %v198_v48, %v219_v9  ;;  %713 = vpow2.f32 %v256_v8  ;;  %v226_v30 = vsub.f32 0.0, %v219_v9 }
  0xe9   : > { %715 = vpow2.f32 %v258_v10 }
  0xea   : > { %v1002_v12 = vpop.eup %705  ;;  %v260_v13 = vmul.f32 1.442695, %v247_v11  ;;  %v239_v33 = vmul.f32 1.442695, %v226_v30 }
  0xeb   : > { %262 = vadd.xlane.f32.xlu1 %v1002_v12  ;;  %v1005_v14 = vpop.eup %707 }
  0xec   : > { %717 = vpow2.f32 %v260_v13 }
  0xed   : > { %719 = vpow2.f32 %v227_v21 }
  0xee   : > { %v1007_v15 = vpop.eup %709  ;;  %721 = vpow2.f32 %v231_v24 }
  0xef   : > { %266 = vadd.xlane.f32.xlu1 %v1005_v14  ;;  %264 = vadd.xlane.f32.xlu0 %v1007_v15  ;;  %v1011_v16 = vpop.eup %711  ;;  %723 = vpow2.f32 %v229_v26 }
  0xf0   : > { %725 = vpow2.f32 %v233_v29 }
  0xf1   : > { %727 = vpow2.f32 %v235_v31 }
  0xf2   : > { %v1013_v17 = vpop.eup %713  ;;  %729 = vpow2.f32 %v237_v32 }
  0xf3   : > { %268 = vadd.xlane.f32.xlu0 %v1011_v16  ;;  %270 = vadd.xlane.f32.xlu1 %v1013_v17  ;;  %v1017_v18 = vpop.eup %715  ;;  %731 = vpow2.f32 %v239_v33 }
  0xf6   : > { %v1019_v19 = vpop.eup %717 }
  0xf7   : > { %272 = vadd.xlane.f32.xlu0 %v1017_v18  ;;  %274 = vadd.xlane.f32.xlu1 %v1019_v19  ;;  %v720_v34 = vpop.eup %719 }
  0xf8   : > { %v722_v37 = vpop.eup %721 }
  0xf9   : > { %v724_v39 = vpop.eup %723 }
  0xfa   : > { %v726_v43 = vpop.eup %725 }
  0xfb   : > { %v728_v44 = vpop.eup %727 }
  0xfc   : > { %v730_v49 = vpop.eup %729 }
  0xfd   : > { %v732_v50 = vpop.eup %731 }
 0x178   : > { %v263_v35 = vpop.xlane.xlu1 %262 }
 0x179   : > { %v276_v36 = vadd.f32 %v720_v34, %v263_v35 }
 0x17b   : > { %733 = vrcp.f32 %v276_v36 }
 0x17c   : > { %v267_v38 = vpop.xlane.xlu1 %266  ;;  %v265_v41 = vpop.xlane.xlu0 %264 }
 0x17d   : > { %v278_v40 = vadd.f32 %v722_v37, %v267_v38  ;;  %v277_v42 = vadd.f32 %v724_v39, %v265_v41 }
 0x17f   : > { %735 = vrcp.f32 %v278_v40 }
 0x180   : > { %737 = vrcp.f32 %v277_v42  ;;  %v271_v45 = vpop.xlane.xlu1 %270  ;;  %v269_v46 = vpop.xlane.xlu0 %268 }
 0x181   : > { %v280_v47 = vadd.f32 %v728_v44, %v271_v45  ;;  %v279_v48 = vadd.f32 %v726_v43, %v269_v46 }
 0x183   : > { %739 = vrcp.f32 %v280_v47 }
 0x184   : > { %741 = vrcp.f32 %v279_v48  ;;  %v275_v52 = vpop.xlane.xlu1 %274  ;;  %v273_v53 = vpop.xlane.xlu0 %272 }
 0x185   : > { %v734_v51 = vpop.eup %733  ;;  %v282_v55 = vadd.f32 %v732_v50, %v275_v52  ;;  %v281_v56 = vadd.f32 %v730_v49, %v273_v53 }
 0x186   : > { %v284_v54 = vmul.f32 0.9872643, %v734_v51 }
 0x187   : > { %743 = vrcp.f32 %v282_v55 }
 0x188   : > { %v297_v57 = vmul.f32 %v720_v34, %v284_v54  ;;  %v311_v58 = vmul.f32 %v1002_v12, %v284_v54  ;;  %745 = vrcp.f32 %v281_v56 }
 0x189   : > { %v736_v59 = vpop.eup %735 }
 0x18a   : > { %v738_v60 = vpop.eup %737  ;;  %v288_v61 = vmul.f32 0.9872643, %v736_v59  ;;  %v318_v62 = vadd.f32 9.872643e-05, %v311_v58 }
 0x18b   : > { %v286_v63 = vmul.f32 0.9872643, %v738_v60 }
 0x18c   : > { %v299_v0 = vmul.f32 %v722_v37, %v288_v61  ;;  %332 = vrot.lane.b32.xlu0 %v318_v62, %s885_s9  ;;  %v313_v7 = vmul.f32 %v1005_v14, %v288_v61 }
 0x18d   : > { %v298_v1 = vmul.f32 %v724_v39, %v286_v63  ;;  %v312_v2 = vmul.f32 %v1007_v15, %v286_v63  ;;  %v740_v3 = vpop.eup %739 }
 0x18e   : > { %v742_v4 = vpop.eup %741  ;;  %v292_v5 = vmul.f32 0.9872643, %v740_v3  ;;  %v320_v22 = vadd.f32 9.872643e-05, %v313_v7  ;;  %v306_v32 = vadd.f32 9.872643e-05, %v299_v0 }
 0x18f   : > { %v319_v6 = vadd.f32 9.872643e-05, %v312_v2  ;;  %v290_v8 = vmul.f32 0.9872643, %v742_v4 }
 0x190   : > { %v301_v9 = vmul.f32 %v728_v44, %v292_v5  ;;  %v315_v10 = vmul.f32 %v1013_v17, %v292_v5 }
 0x191   : > { %334 = vrot.lane.b32.xlu1 %v319_v6, %s885_s9  ;;  %v744_v11 = vpop.eup %743  ;;  %v300_v12 = vmul.f32 %v726_v43, %v290_v8  ;;  %v314_v15 = vmul.f32 %v1011_v16, %v290_v8  ;;  %v304_v16 = vadd.f32 9.872643e-05, %v297_v57 }
 0x192   : > { %v746_v13 = vpop.eup %745  ;;  %v296_v20 = vmul.f32 0.9872643, %v744_v11  ;;  %v322_v21 = vadd.f32 9.872643e-05, %v315_v10  ;;  %v308_v33 = vadd.f32 9.872643e-05, %v301_v9 }
 0x193   : > { %v294_v23 = vmul.f32 0.9872643, %v746_v13  ;;  %v321_v17 = vadd.f32 9.872643e-05, %v314_v15  ;;  %v307_v38 = vadd.f32 9.872643e-05, %v300_v12 }
 0x194   : > { %v303_v24 = vmul.f32 %v732_v50, %v296_v20  ;;  %340 = vrot.lane.b32.xlu0 %v322_v21, %s885_s9  ;;  %v317_v14 = vmul.f32 %v1019_v19, %v296_v20 }
 0x195   : > { %336 = vrot.lane.b32.xlu1 %v320_v22, %s885_s9  ;;  %v302_v25 = vmul.f32 %v730_v49, %v294_v23  ;;  %v316_v27 = vmul.f32 %v1017_v18, %v294_v23  ;;  %v305_v18 = vadd.f32 9.872643e-05, %v298_v1 }
 0x196   : > { %v324_v26 = vadd.f32 9.872643e-05, %v317_v14  ;;  %v310_v39 = vadd.f32 9.872643e-05, %v303_v24 }
 0x197   : > { %v323_v28 = vadd.f32 9.872643e-05, %v316_v27  ;;  %v309_v44 = vadd.f32 9.872643e-05, %v302_v25 }
 0x198   : > { %344 = vrot.lane.b32.xlu0 %v324_v26, %s885_s9 }
 0x199   : > { %338 = vrot.lane.b32.xlu1 %v321_v17, %s885_s9 }
 0x19d   : > { %342 = vrot.lane.b32.xlu1 %v323_v28, %s885_s9 }
 0x1fe   : > { %v333_v29 = vpop.permute.xlu0 %332 }
 0x1ff   : > { %v354_v30 = vsel %vm353_vm0, %v304_v16, %v333_v29  ;;  %362 = vst.msk [vmem:[%s1039_s21 + $0x8] sm:$0xff] %vm353_vm0, %v333_v29 }
 0x200   : > { %361 = vst [vmem:[%s1039_s21] sm:$0xff] %v354_v30 }
 0x203   : > { %v335_v19 = vpop.permute.xlu1 %334 }
 0x204   : > { %v355_v31 = vsel %vm353_vm0, %v305_v18, %v335_v19  ;;  %364 = vst.msk [vmem:[%s1039_s21 + $0x18] sm:$0xff] %vm353_vm0, %v335_v19 }
 0x205   : > { %363 = vst [vmem:[%s1039_s21 + $0x10] sm:$0xff] %v355_v31 }
 0x206   : > { %v341_v35 = vpop.permute.xlu0 %340 }
 0x207   : > { %v337_v34 = vpop.permute.xlu1 %336  ;;  %v358_v37 = vsel %vm353_vm0, %v308_v33, %v341_v35  ;;  %370 = vst.msk [vmem:[%s1039_s21 + $0x48] sm:$0xff] %vm353_vm0, %v341_v35 }
 0x208   : > { %v356_v36 = vsel %vm353_vm0, %v306_v32, %v337_v34  ;;  %366 = vst.msk [vmem:[%s1039_s21 + $0x28] sm:$0xff] %vm353_vm0, %v337_v34  ;;  %369 = vst [vmem:[%s1039_s21 + $0x40] sm:$0xff] %v358_v37 }
 0x209   : > { %365 = vst [vmem:[%s1039_s21 + $0x20] sm:$0xff] %v356_v36 }
 0x20a   : > { %v345_v41 = vpop.permute.xlu0 %344 }
 0x20b   : > { %v339_v40 = vpop.permute.xlu1 %338  ;;  %v360_v43 = vsel %vm353_vm0, %v310_v39, %v345_v41  ;;  %374 = vst.msk [vmem:[%s1039_s21 + $0x68] sm:$0xff] %vm353_vm0, %v345_v41  ;;  %381 = sbr.rel (!%p936_p8) target bundleno = 591 (0x24f), region = 32 }
 0x20c   : > { %v357_v42 = vsel %vm353_vm0, %v307_v38, %v339_v40  ;;  %368 = vst.msk [vmem:[%s1039_s21 + $0x38] sm:$0xff] %vm353_vm0, %v339_v40  ;;  %373 = vst [vmem:[%s1039_s21 + $0x60] sm:$0xff] %v360_v43 }
 0x20d   : > { %367 = vst [vmem:[%s1039_s21 + $0x30] sm:$0xff] %v357_v42 }
 0x20f   : > { %v343_v45 = vpop.permute.xlu1 %342 }
 0x210   : > { %v359_v46 = vsel %vm353_vm0, %v309_v44, %v343_v45  ;;  %372 = vst.msk [vmem:[%s1039_s21 + $0x58] sm:$0xff] %vm353_vm0, %v343_v45 }
 0x211   : > { %371 = vst [vmem:[%s1039_s21 + $0x50] sm:$0xff] %v359_v46 }
 0x212   : > { %s1184_s30 = smov (!%p384_p7, %s383_s30), 7 }
 0x213   : > { %s596_s6 = sshll.u32 %s1184_s30, 8 }
 0x214   : > { %p587_p11 = scmp.eq.s32.totalorder %s596_s6, 0 }
 0x215   : > { %747 = sdivrem.u32 (!%p587_p11), %s1184_s30, 7 }
 0x216   : > { %394 = sbr.rel (%p587_p11) target bundleno = 591 (0x24f), region = 36 }
 0x21e   : > { %s1081_s16 = spop.drf %747 }
 0x21f   : > { %p588_p8 = scmp.le.s32.totalorder %s1081_s16, 0 }
 0x220   : > { %s1174_s10 = smov (!%p588_p8), %s1075_s5  ;;  %s1175_s12 = smov (!%p588_p8), %s1039_s21 }
 0x221   : > { %526 = sbr.rel (%p588_p8) target bundleno = 562 (0x232), region = 90  ;;  %s1090_s13 = smov (!%p588_p8), 0  }
 0x222   : > { %s1092_s17 = smov (!%p588_p8), 0  }
 0x228 LB: >> { %v408_v47 = vld [vmem:[%s855_s12] sm:$0xff]  ;;  %v410_v48 = vld [vmem:[%s855_s12 + $0x10] sm:$0xff]  ;;  %s436_s18 = sadd.s32 1, %s859_s13  ;;  %v422_v54 = vld [vmem:[%s855_s12 + $0x8] sm:$0xff]  ;;  %s402_s17 = sadd.s32 1, %s863_s17   ;;  %s863_s17 = sphi %s1092_s17, %s402_s17   ;;  %s859_s13 = sphi %s1090_s13, %s1176_s13   ;;  %s855_s12 = sphi %s1175_s12, %s441_s12   ;;  %s851_s10 = sphi %s1174_s10, %s442_s10  }
 0x229   : >> { %v412_v49 = vld [vmem:[%s855_s12 + $0x20] sm:$0xff]  ;;  %409 = vst [vmem:[%s851_s10] sm:$0xff] %v408_v47  ;;  %411 = vst [vmem:[%s851_s10 + $0x10] sm:$0xff] %v410_v48  ;;  %v414_v50 = vld [vmem:[%s855_s12 + $0x30] sm:$0xff]  ;;  %p437_p6 = scmp.ge.s32.totalorder %s436_s18, %s1081_s16  ;;  %p401_p9 = scmp.ge.s32.totalorder %s402_s17, %s1081_s16 }
 0x22a   : >> { %413 = vst [vmem:[%s851_s10 + $0x20] sm:$0xff] %v412_v49  ;;  %v416_v51 = vld [vmem:[%s855_s12 + $0x40] sm:$0xff]  ;;  %v418_v52 = vld [vmem:[%s855_s12 + $0x50] sm:$0xff]  ;;  %415 = vst [vmem:[%s851_s10 + $0x30] sm:$0xff] %v414_v50 }
 0x22b   : >> { %417 = vst [vmem:[%s851_s10 + $0x40] sm:$0xff] %v416_v51  ;;  %419 = vst [vmem:[%s851_s10 + $0x50] sm:$0xff] %v418_v52  ;;  %v420_v53 = vld [vmem:[%s855_s12 + $0x60] sm:$0xff]  ;;  %v424_v55 = vld [vmem:[%s855_s12 + $0x18] sm:$0xff]  ;;  %s1186_s18 = smov (%p437_p6, %s436_s18), 0  ;;  %404 = sbr.rel (!%p401_p9) target bundleno = 552 (0x228), region = 96 }
 0x22c   : >> { %421 = vst [vmem:[%s851_s10 + $0x60] sm:$0xff] %v420_v53  ;;  %423 = vst [vmem:[%s851_s10 + $0x8] sm:$0xff] %v422_v54  ;;  %v426_v56 = vld [vmem:[%s855_s12 + $0x28] sm:$0xff]  ;;  %v428_v57 = vld [vmem:[%s855_s12 + $0x38] sm:$0xff]  ;;  %s439_s19 = smul.u32 112, %s1186_s18  ;;  %s1176_s13 = smov %s1186_s18 }
 0x22d   : >> { %425 = vst [vmem:[%s851_s10 + $0x18] sm:$0xff] %v424_v55  ;;  %v430_v58 = vld [vmem:[%s855_s12 + $0x48] sm:$0xff]  ;;  %427 = vst [vmem:[%s851_s10 + $0x28] sm:$0xff] %v426_v56  ;;  %v432_v59 = vld [vmem:[%s855_s12 + $0x58] sm:$0xff] }
 0x22e   : >> { %429 = vst [vmem:[%s851_s10 + $0x38] sm:$0xff] %v428_v57  ;;  %431 = vst [vmem:[%s851_s10 + $0x48] sm:$0xff] %v430_v58  ;;  %v434_v60 = vld [vmem:[%s855_s12 + $0x68] sm:$0xff]  ;;  %s441_s12 = scalar_lea.vmem %s1039_s21, %s439_s19 [#allocation4]  }
 0x22f   : >> { %433 = vst [vmem:[%s851_s10 + $0x58] sm:$0xff] %v432_v59  ;;  %435 = vst [vmem:[%s851_s10 + $0x68] sm:$0xff] %v434_v60  ;;  %s442_s10 = scalar_lea.vmem %s1075_s5, %s439_s19  }
 0x232 PF: > { %749 = sdivrem.u32 %s1184_s30, 7 }
 0x233   : > { %s589_s20 = smul.u32 112, %s1081_s16 }
 0x235   : > { %s1148_s22 = scalar_lea.vmem %s1039_s21, %s589_s20 [#allocation4]   ;;  %s1151_s24 = scalar_lea.vmem %s1075_s5, %s589_s20  }
 0x23b   : > { %s750_s25 = spop.drf %749 }
 0x23c   : > { %p591_p10 = scmp.le.s32.totalorder %s750_s25, 0 }
 0x23d   : > { %s865_s27 = smov (!%p591_p10), %s1151_s24   ;;  %s869_s28 = smov (!%p591_p10), %s1148_s22  }
 0x23e   : > { %540 = sbr.rel (%p591_p10) target bundleno = 591 (0x24f), region = 101  ;;  %s873_s29 = smov (!%p591_p10), 0  }
 0x23f   : > { %s877_s2 = smov (!%p591_p10), 0  }
 0x245 LB: >> { %v459_v61 = vld [vmem:[%s871_s28] sm:$0xff]  ;;  %v461_v62 = vld [vmem:[%s871_s28 + $0x8] sm:$0xff]  ;;  %s463_s9 = sadd.s32 1, %s875_s29  ;;  %s453_s2 = sadd.s32 1, %s879_s2   ;;  %s879_s2 = sphi %s877_s2, %s453_s2   ;;  %s875_s29 = sphi %s873_s29, %s874_s29   ;;  %s871_s28 = sphi %s869_s28, %s468_s28   ;;  %s867_s27 = sphi %s865_s27, %s469_s27  }
 0x246   : >> { %460 = vst [vmem:[%s867_s27] sm:$0xff] %v459_v61  ;;  %462 = vst [vmem:[%s867_s27 + $0x8] sm:$0xff] %v461_v62  ;;  %p464_p12 = scmp.ge.s32.totalorder %s463_s9, %s750_s25  ;;  %p452_p13 = scmp.ge.s32.totalorder %s453_s2, %s750_s25 }
 0x248   : >> { %s1188_s9 = smov (%p464_p12, %s463_s9), 0  ;;  %455 = sbr.rel (!%p452_p13) target bundleno = 581 (0x245), region = 107 }
 0x249   : >> { %s592_s15 = sshll.u32 %s1188_s9, 4  ;;  %s874_s29 = smov %s1188_s9  }
 0x24a   : >> { %s468_s28 = scalar_lea.vmem %s1148_s22, %s592_s15 [#allocation4]   ;;  %s469_s27 = scalar_lea.vmem %s1151_s24, %s592_s15  }
 0x24f PF: > { %p11_p1 = scmp.ge.s32.totalorder %s918_s11, 6   ;;  %s1177_s6 = smov %s839_s7 }
 0x250   : > { %s1178_s7 = smov %s843_s8  ;;  %s1179_s8 = smov %s928_s14 }
 0x251   : > { %s1180_s9 = smov %s918_s11  ;;  %13 = sbr.rel (!%p11_p1) target bundleno = 3 (0x3), region = 118 }
 0x258   :  { %485 = vsyncpa [#allocation3], 1 }
 0x259   :  { %487 = vsyncpa [#allocation3 + $0x1], 1 }

</bundles_post_ra>
